<compile_context>
chip_gen: v7x
topology: tpu7x:2x2x1
jax: 0.10.0
libtpu: 0.0.40
codegen_flags: <defaults>
</compile_context>

<pallas_src>
import jax
import jax.numpy as jnp
from jax.experimental import pallas as pl
from jax.experimental.pallas import tpu as pltpu

NUM_MOVIES = 1000            # constant from the CIL project
ENCODING_SIZE = 32
HIDDEN = 256
MAX_TILE_B = 1024            # safe on v7x 64 MiB VMEM with default scoped limit


def _round_up(v, m):
    return ((v + m - 1) // m) * m


def decoder_kernel(x_ref, w1_ref, b1_ref, w2_ref, b2_ref, out_ref):
    # Linear 1 (bf16 MXU inputs, f32 accumulation) + bias + LeakyReLU(0.01, PyTorch default).
    h = jnp.dot(x_ref[...], w1_ref[...], preferred_element_type=jnp.float32) + b1_ref[...]
    h = jnp.where(h > 0, h, jnp.float32(0.01) * h)
    # Dropout: identity in eval mode.
    # TODO(synk): training-mode dropout (mask * 1/(1-p)) could be added via pltpu.prng_*.
    h = h.astype(jnp.bfloat16)
    out = jnp.dot(h, w2_ref[...], preferred_element_type=jnp.float32) + b2_ref[...]
    out_ref[...] = out.astype(out_ref.dtype)


def prepare_params(w1, b1, w2, b2):
    """One-time weight preprocessing (keep out of the per-call hot path).

    Weights are stored (in, out) so the kernel computes x @ W + b, equivalent to
    PyTorch's x @ W.T + b with W stored (out, in).
    """
    return (w1.astype(jnp.bfloat16),
            b1.reshape(1, HIDDEN).astype(jnp.float32),
            w2.astype(jnp.bfloat16),
            b2.reshape(1, NUM_MOVIES).astype(jnp.float32))


def decoder_forward(x, params, *, tile_b_max=MAX_TILE_B, out_dtype=jnp.float32):
    """x: (B, ENCODING_SIZE) f32 -> (B, NUM_MOVIES) out_dtype."""
    w1_bf, b1_f32, w2_bf, b2_f32 = params
    B = x.shape[0]

    # Batch tile selection:
    #  * >=2 grid steps whenever B > 16 so the "parallel" batch axis can shard across
    #    v7x's two TensorCores.
    #  * near-even split (avoids a nearly-empty padded edge tile when B is just over
    #    a multiple of tile_b_max), rounded up to a multiple of 16 (bf16 sublanes).
    n_steps = max(pl.cdiv(B, tile_b_max), 2 if B > 16 else 1)
    tile_b = max(8, _round_up(pl.cdiv(B, n_steps), 16))
    tile_b = min(tile_b, _round_up(B, 8))
    grid = (pl.cdiv(B, tile_b),)

    x_bf = x.astype(jnp.bfloat16)

    cost = pl.CostEstimate(
        flops=2 * B * (ENCODING_SIZE * HIDDEN + HIDDEN * NUM_MOVIES),
        transcendentals=0,
        bytes_accessed=(
            B * ENCODING_SIZE * 2                                   # x (bf16) in
            + B * NUM_MOVIES * jnp.dtype(out_dtype).itemsize        # output writeback
            + ENCODING_SIZE * HIDDEN * 2                            # w1 (bf16)
            + HIDDEN * NUM_MOVIES * 2                               # w2 (bf16)
            + (HIDDEN + NUM_MOVIES) * 4                             # biases (f32)
        ),
    )

    return pl.pallas_call(
        decoder_kernel,
        out_shape=jax.ShapeDtypeStruct((B, NUM_MOVIES), out_dtype),
        grid=grid,
        in_specs=[
            pl.BlockSpec((tile_b, ENCODING_SIZE), lambda i: (i, 0)),   # x tile
            pl.BlockSpec((ENCODING_SIZE, HIDDEN), lambda i: (0, 0)),   # w1 (resident)
            pl.BlockSpec((1, HIDDEN), lambda i: (0, 0)),               # b1 (resident)
            pl.BlockSpec((HIDDEN, NUM_MOVIES), lambda i: (0, 0)),      # w2 (resident)
            pl.BlockSpec((1, NUM_MOVIES), lambda i: (0, 0)),           # b2 (resident)
        ],
        out_specs=pl.BlockSpec((tile_b, NUM_MOVIES), lambda i: (i, 0)),
        compiler_params=pltpu.CompilerParams(
            dimension_semantics=("parallel",),
        ),
        cost_estimate=cost,
    )(x_bf, w1_bf, b1_f32, w2_bf, b2_f32)


def init_params(key):
    """Deterministic synthetic parameters with the module's shapes (stored (in, out))."""
    k1, k2, k3, k4 = jax.random.split(key, 4)
    w1 = jax.random.normal(k1, (ENCODING_SIZE, HIDDEN), jnp.float32) * 0.05
    b1 = jax.random.normal(k2, (HIDDEN,), jnp.float32) * 0.05
    w2 = jax.random.normal(k3, (HIDDEN, NUM_MOVIES), jnp.float32) * 0.05
    b2 = jax.random.normal(k4, (NUM_MOVIES,), jnp.float32) * 0.05
    return w1, b1, w2, b2


def reference_forward(x, w1, b1, w2, b2, cast_bf16=False):
    if cast_bf16:
        x = x.astype(jnp.bfloat16)
        w1 = w1.astype(jnp.bfloat16)
        w2 = w2.astype(jnp.bfloat16)
    h = jnp.dot(x, w1, preferred_element_type=jnp.float32) + b1
    h = jnp.where(h > 0, h, jnp.float32(0.01) * h)
    if cast_bf16:
        h = h.astype(jnp.bfloat16)
    return jnp.dot(h, w2, preferred_element_type=jnp.float32) + b2


if __name__ == "__main__":
    key = jax.random.PRNGKey(0)
    k_x, k_p, k_x2 = jax.random.split(key, 3)

    w1, b1, w2, b2 = init_params(k_p)
    params = prepare_params(w1, b1, w2, b2)   # one-time preprocessing, outside hot path

    # Small batch (single grid step, full-block batch dim).
    B = 8
    x = jax.random.normal(k_x, (B, ENCODING_SIZE), jnp.float32)
    out = jax.block_until_ready(decoder_forward(x, params))
    assert out.shape == (B, NUM_MOVIES)

    ref_bf16 = reference_forward(x, w1, b1, w2, b2, cast_bf16=True)
    assert jnp.allclose(out, ref_bf16, atol=5e-3, rtol=5e-3), "mismatch vs bf16 reference"
    ref_f32 = reference_forward(x, w1, b1, w2, b2, cast_bf16=False)
    assert jnp.allclose(out, ref_f32, atol=3e-2, rtol=3e-2), "mismatch vs f32 reference"

    # Medium batch: exercises >=2 grid steps and the partial edge block (200 % 112 != 0).
    B2 = 200
    x2 = jax.random.normal(k_x2, (B2, ENCODING_SIZE), jnp.float32)
    out2 = jax.block_until_ready(decoder_forward(x2, params))
    assert out2.shape == (B2, NUM_MOVIES)
    ref2 = reference_forward(x2, w1, b1, w2, b2, cast_bf16=True)
    assert jnp.allclose(out2, ref2, atol=5e-3, rtol=5e-3), "mismatch vs bf16 reference (B=200)"

    print("KERNEL_OK")
</pallas_src>

<mosaic_0001>
module attributes {stable_mosaic.version = 11 : i64} {
  func.func @decoder_kernel(%arg0: i32, %arg1: memref<8x32xbf16, #tpu.memory_space<vmem>>, %arg2: memref<32x256xbf16, #tpu.memory_space<vmem>>, %arg3: memref<1x256xf32, #tpu.memory_space<vmem>>, %arg4: memref<256x1000xbf16, #tpu.memory_space<vmem>>, %arg5: memref<1x1000xf32, #tpu.memory_space<vmem>>, %arg6: memref<8x1000xf32, #tpu.memory_space<vmem>>) attributes {dimension_semantics = [#tpu.dimension_semantics<parallel>], iteration_bounds = array<i64: 1>, scalar_prefetch = 0 : i64, scratch_operands = 0 : i64, tpu.core_type = #tpu.core_type<tc>, window_params = [{transform_indices = @transform_0, window_bounds = array<i64: 8, 32>}, {pipeline_mode = #tpu.pipeline_mode<synchronous>, transform_indices = @transform_1, window_bounds = array<i64: 32, 256>}, {pipeline_mode = #tpu.pipeline_mode<synchronous>, transform_indices = @transform_2, window_bounds = array<i64: 1, 256>}, {pipeline_mode = #tpu.pipeline_mode<synchronous>, transform_indices = @transform_3, window_bounds = array<i64: 256, 1000>}, {pipeline_mode = #tpu.pipeline_mode<synchronous>, transform_indices = @transform_4, window_bounds = array<i64: 1, 1000>}, {transform_indices = @transform_5, window_bounds = array<i64: 8, 1000>}]} {
    %c0 = arith.constant 0 : index
    %c0_0 = arith.constant 0 : index
    %0 = vector.load %arg1[%c0, %c0_0] : memref<8x32xbf16, #tpu.memory_space<vmem>>, vector<8x32xbf16>
    %c0_1 = arith.constant 0 : index
    %c0_2 = arith.constant 0 : index
    %1 = vector.load %arg2[%c0_1, %c0_2] : memref<32x256xbf16, #tpu.memory_space<vmem>>, vector<32x256xbf16>
    %cst = arith.constant dense<0.000000e+00> : vector<8x256xf32>
    %2 = tpu.matmul %0, %1, %cst {dimension_numbers = #tpu.dot_dimension_numbers<[1], [0], [0], [1], [0, 0, 1, 1], [], []>} : vector<8x32xbf16>, vector<32x256xbf16>, vector<8x256xf32> -> vector<8x256xf32>
    %c0_3 = arith.constant 0 : index
    %c0_4 = arith.constant 0 : index
    %3 = vector.load %arg3[%c0_3, %c0_4] : memref<1x256xf32, #tpu.memory_space<vmem>>, vector<1x256xf32>
    %4 = vector.broadcast %3 : vector<1x256xf32> to vector<8x256xf32>
    %5 = arith.addf %2, %4 : vector<8x256xf32>
    %cst_5 = arith.constant 0.000000e+00 : f32
    %6 = vector.broadcast %cst_5 : f32 to vector<8x256xf32>
    %7 = arith.cmpf ogt, %5, %6 : vector<8x256xf32>
    %cst_6 = arith.constant 0.00999999977 : f32
    %8 = vector.broadcast %cst_6 : f32 to vector<8x256xf32>
    %9 = arith.mulf %8, %5 : vector<8x256xf32>
    %10 = arith.select %7, %5, %9 : vector<8x256xi1>, vector<8x256xf32>
    %11 = arith.truncf %10 : vector<8x256xf32> to vector<8x256xbf16>
    %c0_7 = arith.constant 0 : index
    %c0_8 = arith.constant 0 : index
    %12 = vector.load %arg4[%c0_7, %c0_8] : memref<256x1000xbf16, #tpu.memory_space<vmem>>, vector<256x1000xbf16>
    %cst_9 = arith.constant dense<0.000000e+00> : vector<8x1000xf32>
    %13 = tpu.matmul %11, %12, %cst_9 {dimension_numbers = #tpu.dot_dimension_numbers<[1], [0], [0], [1], [0, 0, 1, 1], [], []>} : vector<8x256xbf16>, vector<256x1000xbf16>, vector<8x1000xf32> -> vector<8x1000xf32>
    %c0_10 = arith.constant 0 : index
    %c0_11 = arith.constant 0 : index
    %14 = vector.load %arg5[%c0_10, %c0_11] : memref<1x1000xf32, #tpu.memory_space<vmem>>, vector<1x1000xf32>
    %15 = vector.broadcast %14 : vector<1x1000xf32> to vector<8x1000xf32>
    %16 = arith.addf %13, %15 : vector<8x1000xf32>
    %c0_12 = arith.constant 0 : index
    %c0_13 = arith.constant 0 : index
    %17 = vector.load %arg6[%c0_12, %c0_13] : memref<8x1000xf32, #tpu.memory_space<vmem>>, vector<8x1000xf32>
    tpu.vector_store %arg6[%c0_12, %c0_13], %16 {strides = array<i32>} : memref<8x1000xf32, #tpu.memory_space<vmem>>, vector<8x1000xf32>,
    return
  }
  func.func @transform_0(%arg0: i32) -> (i32, i32) {
    %c0_i32 = arith.constant 0 : i32
    %c0_i32_0 = arith.constant 0 : i32
    return %arg0, %c0_i32 : i32, i32
  }
  func.func @transform_1(%arg0: i32) -> (i32, i32) {
    %c0_i32 = arith.constant 0 : i32
    %c0_i32_0 = arith.constant 0 : i32
    %c0_i32_1 = arith.constant 0 : i32
    return %c0_i32, %c0_i32_0 : i32, i32
  }
  func.func @transform_2(%arg0: i32) -> (i32, i32) {
    %c0_i32 = arith.constant 0 : i32
    %c0_i32_0 = arith.constant 0 : i32
    %c0_i32_1 = arith.constant 0 : i32
    return %c0_i32, %c0_i32_0 : i32, i32
  }
  func.func @transform_3(%arg0: i32) -> (i32, i32) {
    %c0_i32 = arith.constant 0 : i32
    %c0_i32_0 = arith.constant 0 : i32
    %c0_i32_1 = arith.constant 0 : i32
    return %c0_i32, %c0_i32_0 : i32, i32
  }
  func.func @transform_4(%arg0: i32) -> (i32, i32) {
    %c0_i32 = arith.constant 0 : i32
    %c0_i32_0 = arith.constant 0 : i32
    %c0_i32_1 = arith.constant 0 : i32
    return %c0_i32, %c0_i32_0 : i32, i32
  }
  func.func @transform_5(%arg0: i32) -> (i32, i32) {
    %c0_i32 = arith.constant 0 : i32
    %c0_i32_0 = arith.constant 0 : i32
    return %arg0, %c0_i32 : i32, i32
  }
}

</mosaic_0001>

<bundles_post_ra>
// kernel: tpu_custom_call.1
= control target key start
LH: loop header
LB: loop body
LE: loop exit
PB: predicated region body
PF: predicated region fallthrough
CT: control target
= control target key end

     0   :  { %v1274_v2 = vmov 0   ;;  %vm59_vm0 = vcmask 261120   ;;  %s1747_s0 = inlined_call_operand.vmem [shape: bf16[8,32], index: 0, kind: input, shape index: {}]   ;;  %s1748_s1 = inlined_call_operand.vmem [shape: bf16[32,256], index: 1, kind: input, shape index: {}]   ;;  %s1749_s2 = inlined_call_operand.vmem [shape: f32[1,256], index: 2, kind: input, shape index: {}]   ;;  %s1750_s3 = inlined_call_operand.vmem [shape: bf16[256,1000], index: 3, kind: input, shape index: {}]   ;;  %s1751_s4 = inlined_call_operand.vmem [shape: f32[1,1000], index: 4, kind: input, shape index: {}]   ;;  %s1752_s5 = inlined_call_operand.hbm [shape: f32[8,1000], index: 5, kind: output, shape index: {}]  }
   0x1   :  { %v1244_v0 = vld [vmem:[%s1748_s1 + $0x4] ss:$8 sps:$4 sm:$0xff]   ;;  %v1246_v1 = vld [vmem:[%s1748_s1] ss:$8 sps:$4 sm:$0xff]   ;;  %95 = vmatprep.mubr.bf16.mxu0 %v1274_v2  ;;  %v1247_v3 = vld [vmem:[%s1748_s1 + $0x14] ss:$8 sps:$4 sm:$0xff]  }
   0x2   :  { %63 = vmatprep.subr.bf16.mxu0 %v1244_v0  ;;  %v1249_v4 = vld [vmem:[%s1748_s1 + $0x10] ss:$8 sps:$4 sm:$0xff]   ;;  %v112_v5 = vld [vmem:[%s1750_s3] sm:$0xff]  ;;  %v113_v7 = vld [vmem:[%s1750_s3 + $0x8] sm:$0xff] }
   0x3   :  { %64 = vmatpush1.bf16.msra.mxu0 %v1246_v1  ;;  %v116_v6 = vld [vmem:[%s1750_s3 + $0x20] sm:$0xff]  ;;  %v117_v9 = vld [vmem:[%s1750_s3 + $0x28] sm:$0xff] }
   0x4   :  { %65 = vmatprep.subr.bf16.mxu0 %v1247_v3  ;;  %v1115_v8 = vcombine.high %v112_v5, %v116_v6  ;;  %v1114_v10 = vcombine.low %v112_v5, %v116_v6  ;;  %v120_v11 = vld [vmem:[%s1750_s3 + $0x40] sm:$0xff]  ;;  %v1117_v13 = vcombine.high %v113_v7, %v117_v9  ;;  %v121_v15 = vld [vmem:[%s1750_s3 + $0x48] sm:$0xff]  ;;  %v1116_v20 = vcombine.low %v113_v7, %v117_v9 }
   0x5   :  { %v124_v12 = vld [vmem:[%s1750_s3 + $0x60] sm:$0xff]  ;;  %v125_v16 = vld [vmem:[%s1750_s3 + $0x68] sm:$0xff] }
   0x6   :  { %v1123_v14 = vcombine.high %v120_v11, %v124_v12  ;;  %v128_v17 = vld [vmem:[%s1750_s3 + $0x80] sm:$0xff]  ;;  %922 = vmatprep.subr.bf16.mxu1 %v1115_v8  ;;  %v1122_v21 = vcombine.low %v120_v11, %v124_v12  ;;  %v1125_v22 = vcombine.high %v121_v15, %v125_v16  ;;  %v129_v24 = vld [vmem:[%s1750_s3 + $0x88] sm:$0xff]  ;;  %v1124_v28 = vcombine.low %v121_v15, %v125_v16 }
   0x7   :  { %v132_v18 = vld [vmem:[%s1750_s3 + $0xa0] sm:$0xff]  ;;  %66 = vmatpush1.bf16.msra.mxu0 %v1249_v4  ;;  %923 = vmatpush1.bf16.msra.mxu1 %v1114_v10  ;;  %v133_v25 = vld [vmem:[%s1750_s3 + $0xa8] sm:$0xff] }
   0x8   :  { %v22_v19 = vld [vmem:[%s1747_s0] sm:$0xf]  ;;  %963 = vmatprep.subr.bf16.mxu0 %v1117_v13  ;;  %924 = vmatprep.subr.bf16.mxu1 %v1123_v14  ;;  %v1131_v23 = vcombine.high %v128_v17, %v132_v18  ;;  %v1130_v29 = vcombine.low %v128_v17, %v132_v18  ;;  %v1133_v30 = vcombine.high %v129_v24, %v133_v25  ;;  %v137_v32 = vld [vmem:[%s1750_s3 + $0xc8] sm:$0xff] }
   0x9   :  { %v136_v26 = vld [vmem:[%s1750_s3 + $0xc0] sm:$0xff]  ;;  %v141_v33 = vld [vmem:[%s1750_s3 + $0xe8] sm:$0xff]  ;;  %v1132_v36 = vcombine.low %v129_v24, %v133_v25 }
   0xa   :  { %v140_v27 = vld [vmem:[%s1750_s3 + $0xe0] sm:$0xff]  ;;  %1113 = vmatmul.mubr.msk.bf16.vlgmr.msra.gmra.mrb[0].mxu0 %vm59_vm0, %v22_v19  ;;  %v1141_v38 = vcombine.high %v137_v32, %v141_v33  ;;  %v145_v40 = vld [vmem:[%s1750_s3 + $0x108] sm:$0xff]  ;;  %v1140_v44 = vcombine.low %v137_v32, %v141_v33 }
   0xb   :  { %964 = vmatpush1.bf16.msra.mxu0 %v1116_v20  ;;  %925 = vmatpush1.bf16.msra.mxu1 %v1122_v21  ;;  %v1139_v31 = vcombine.high %v136_v26, %v140_v27  ;;  %v144_v34 = vld [vmem:[%s1750_s3 + $0x100] sm:$0xff]  ;;  %v1138_v37 = vcombine.low %v136_v26, %v140_v27  ;;  %v149_v41 = vld [vmem:[%s1750_s3 + $0x128] sm:$0xff] }
   0xc   :  { %965 = vmatprep.subr.bf16.mxu0 %v1125_v22  ;;  %926 = vmatprep.subr.bf16.mxu1 %v1131_v23  ;;  %v148_v35 = vld [vmem:[%s1750_s3 + $0x120] sm:$0xff]  ;;  %v1149_v46 = vcombine.high %v145_v40, %v149_v41  ;;  %v153_v48 = vld [vmem:[%s1750_s3 + $0x148] sm:$0xff] }
   0xd   :  { %v1147_v39 = vcombine.high %v144_v34, %v148_v35  ;;  %v152_v42 = vld [vmem:[%s1750_s3 + $0x140] sm:$0xff]  ;;  %v1146_v45 = vcombine.low %v144_v34, %v148_v35  ;;  %v157_v49 = vld [vmem:[%s1750_s3 + $0x168] sm:$0xff] }
   0xe   :  { %v156_v43 = vld [vmem:[%s1750_s3 + $0x160] sm:$0xff] }
   0xf   :  { %966 = vmatpush1.bf16.msra.mxu0 %v1124_v28  ;;  %927 = vmatpush1.bf16.msra.mxu1 %v1130_v29  ;;  %v1155_v47 = vcombine.high %v152_v42, %v156_v43  ;;  %v160_v50 = vld [vmem:[%s1750_s3 + $0x180] sm:$0xff] }
  0x10   :  { %967 = vmatprep.subr.bf16.mxu0 %v1133_v30  ;;  %928 = vmatprep.subr.bf16.mxu1 %v1139_v31  ;;  %v164_v51 = vld [vmem:[%s1750_s3 + $0x1a0] sm:$0xff] }
  0x13   :  { %968 = vmatpush1.bf16.msra.mxu0 %v1132_v36  ;;  %929 = vmatpush1.bf16.msra.mxu1 %v1138_v37 }
  0x14   :  { %969 = vmatprep.subr.bf16.mxu0 %v1141_v38  ;;  %930 = vmatprep.subr.bf16.mxu1 %v1147_v39 }
  0x15   :  { %10 = vsyncpa [#allocation3], 0  ;;  %v1148_v52 = vcombine.low %v145_v40, %v149_v41  ;;  %v1154_v53 = vcombine.low %v152_v42, %v156_v43  ;;  %v1157_v54 = vcombine.high %v153_v48, %v157_v49  ;;  %v1163_v55 = vcombine.high %v160_v50, %v164_v51  ;;  %v161_v56 = vld [vmem:[%s1750_s3 + $0x188] sm:$0xff]  ;;  %v168_v58 = vld [vmem:[%s1750_s3 + $0x1c0] sm:$0xff] }
  0x16   :  { %v165_v57 = vld [vmem:[%s1750_s3 + $0x1a8] sm:$0xff]  ;;  %v172_v59 = vld [vmem:[%s1750_s3 + $0x1e0] sm:$0xff]  ;;  %v1156_v60 = vcombine.low %v153_v48, %v157_v49  ;;  %v1162_v61 = vcombine.low %v160_v50, %v164_v51  ;;  %vm1093_vm3 = vcmask 850944  }
  0x17   :  { %970 = vmatpush1.bf16.msra.mxu0 %v1140_v44  ;;  %931 = vmatpush1.bf16.msra.mxu1 %v1146_v45  ;;  %v1165_v62 = vcombine.high %v161_v56, %v165_v57  ;;  %v1171_v63 = vcombine.high %v168_v58, %v172_v59  ;;  %v169_v0 = vld [vmem:[%s1750_s3 + $0x1c8] sm:$0xff]  ;;  %v176_v2 = vld [vmem:[%s1750_s3 + $0x200] sm:$0xff]  ;;  %v1164_v4 = vcombine.low %v161_v56, %v165_v57 }
  0x18   :  { %971 = vmatprep.subr.bf16.mxu0 %v1149_v46  ;;  %932 = vmatprep.subr.bf16.mxu1 %v1155_v47  ;;  %v173_v1 = vld [vmem:[%s1750_s3 + $0x1e8] sm:$0xff]  ;;  %v180_v3 = vld [vmem:[%s1750_s3 + $0x220] sm:$0xff]  ;;  %v1170_v5 = vcombine.low %v168_v58, %v172_v59 }
  0x19   :  { %v1173_v6 = vcombine.high %v169_v0, %v173_v1  ;;  %v1179_v7 = vcombine.high %v176_v2, %v180_v3  ;;  %v177_v8 = vld [vmem:[%s1750_s3 + $0x208] sm:$0xff]  ;;  %v184_v10 = vld [vmem:[%s1750_s3 + $0x240] sm:$0xff]  ;;  %v1172_v12 = vcombine.low %v169_v0, %v173_v1  ;;  %v1178_v13 = vcombine.low %v176_v2, %v180_v3 }
  0x1a   :  { %v181_v9 = vld [vmem:[%s1750_s3 + $0x228] sm:$0xff]  ;;  %v188_v11 = vld [vmem:[%s1750_s3 + $0x260] sm:$0xff] }
  0x1b   :  { %972 = vmatpush1.bf16.msra.mxu0 %v1148_v52  ;;  %933 = vmatpush1.bf16.msra.mxu1 %v1154_v53  ;;  %v1181_v14 = vcombine.high %v177_v8, %v181_v9  ;;  %v1187_v15 = vcombine.high %v184_v10, %v188_v11  ;;  %v185_v16 = vld [vmem:[%s1750_s3 + $0x248] sm:$0xff]  ;;  %v192_v18 = vld [vmem:[%s1750_s3 + $0x280] sm:$0xff]  ;;  %v1180_v20 = vcombine.low %v177_v8, %v181_v9  ;;  %v115_v8 = vld [vmem:[%s1750_s3 + $0x18] sm:$0xff] }
  0x1c   :  { %973 = vmatprep.subr.bf16.mxu0 %v1157_v54  ;;  %934 = vmatprep.subr.bf16.mxu1 %v1163_v55  ;;  %v189_v17 = vld [vmem:[%s1750_s3 + $0x268] sm:$0xff]  ;;  %v196_v19 = vld [vmem:[%s1750_s3 + $0x2a0] sm:$0xff]  ;;  %v1186_v21 = vcombine.low %v184_v10, %v188_v11  ;;  %v119_v10 = vld [vmem:[%s1750_s3 + $0x38] sm:$0xff] }
  0x1d   :  { %v1189_v22 = vcombine.high %v185_v16, %v189_v17  ;;  %v1195_v23 = vcombine.high %v192_v18, %v196_v19  ;;  %v193_v24 = vld [vmem:[%s1750_s3 + $0x288] sm:$0xff]  ;;  %v200_v26 = vld [vmem:[%s1750_s3 + $0x2c0] sm:$0xff]  ;;  %v1188_v28 = vcombine.low %v185_v16, %v189_v17  ;;  %v1194_v29 = vcombine.low %v192_v18, %v196_v19 }
  0x1e   :  { %v197_v25 = vld [vmem:[%s1750_s3 + $0x2a8] sm:$0xff]  ;;  %v204_v27 = vld [vmem:[%s1750_s3 + $0x2e0] sm:$0xff] }
  0x1f   :  { %974 = vmatpush1.bf16.msra.mxu0 %v1156_v60  ;;  %935 = vmatpush1.bf16.msra.mxu1 %v1162_v61  ;;  %v1197_v30 = vcombine.high %v193_v24, %v197_v25  ;;  %v1203_v31 = vcombine.high %v200_v26, %v204_v27  ;;  %v201_v32 = vld [vmem:[%s1750_s3 + $0x2c8] sm:$0xff]  ;;  %v208_v34 = vld [vmem:[%s1750_s3 + $0x300] sm:$0xff]  ;;  %v1196_v36 = vcombine.low %v193_v24, %v197_v25 }
  0x20   :  { %975 = vmatprep.subr.bf16.mxu0 %v1165_v62  ;;  %936 = vmatprep.subr.bf16.mxu1 %v1171_v63  ;;  %v205_v33 = vld [vmem:[%s1750_s3 + $0x2e8] sm:$0xff]  ;;  %v212_v35 = vld [vmem:[%s1750_s3 + $0x320] sm:$0xff]  ;;  %v1202_v37 = vcombine.low %v200_v26, %v204_v27 }
  0x21   :  { %v1205_v38 = vcombine.high %v201_v32, %v205_v33  ;;  %v1211_v39 = vcombine.high %v208_v34, %v212_v35  ;;  %v209_v40 = vld [vmem:[%s1750_s3 + $0x308] sm:$0xff]  ;;  %v216_v42 = vld [vmem:[%s1750_s3 + $0x340] sm:$0xff]  ;;  %v1204_v44 = vcombine.low %v201_v32, %v205_v33  ;;  %v1210_v45 = vcombine.low %v208_v34, %v212_v35  ;;  %v126_v32 = vld [vmem:[%s1750_s3 + $0x70] sm:$0xff] }
  0x22   :  { %v213_v41 = vld [vmem:[%s1750_s3 + $0x328] sm:$0xff]  ;;  %v220_v43 = vld [vmem:[%s1750_s3 + $0x360] sm:$0xff]  ;;  %v123_v33 = vld [vmem:[%s1750_s3 + $0x58] sm:$0xff] }
  0x23   :  { %976 = vmatpush1.bf16.msra.mxu0 %v1164_v4  ;;  %937 = vmatpush1.bf16.msra.mxu1 %v1170_v5  ;;  %v1213_v46 = vcombine.high %v209_v40, %v213_v41  ;;  %v1219_v47 = vcombine.high %v216_v42, %v220_v43  ;;  %v217_v48 = vld [vmem:[%s1750_s3 + $0x348] sm:$0xff]  ;;  %v1212_v50 = vcombine.low %v209_v40, %v213_v41  ;;  %v224_v54 = vld [vmem:[%s1750_s3 + $0x380] sm:$0xff]  ;;  %v127_v34 = vld [vmem:[%s1750_s3 + $0x78] sm:$0xff] }
  0x24   :  { %977 = vmatprep.subr.bf16.mxu0 %v1173_v6  ;;  %938 = vmatprep.subr.bf16.mxu1 %v1179_v7  ;;  %v221_v49 = vld [vmem:[%s1750_s3 + $0x368] sm:$0xff]  ;;  %v1218_v51 = vcombine.low %v216_v42, %v220_v43  ;;  %v228_v55 = vld [vmem:[%s1750_s3 + $0x3a0] sm:$0xff]  ;;  %v114_v6 = vld [vmem:[%s1750_s3 + $0x10] sm:$0xff] }
  0x25   :  { %v1221_v52 = vcombine.high %v217_v48, %v221_v49  ;;  %v1220_v53 = vcombine.low %v217_v48, %v221_v49  ;;  %v225_v56 = vld [vmem:[%s1750_s3 + $0x388] sm:$0xff]  ;;  %v1227_v57 = vcombine.high %v224_v54, %v228_v55  ;;  %v1226_v61 = vcombine.low %v224_v54, %v228_v55  ;;  %v232_v62 = vld [vmem:[%s1750_s3 + $0x3c0] sm:$0xff]  ;;  %v118_v7 = vld [vmem:[%s1750_s3 + $0x30] sm:$0xff] }
  0x26   :  { %v229_v58 = vld [vmem:[%s1750_s3 + $0x3a8] sm:$0xff]  ;;  %v236_v63 = vld [vmem:[%s1750_s3 + $0x3e0] sm:$0xff]  ;;  %v1119_v9 = vcombine.high %v114_v6, %v118_v7  ;;  %v1118_v11 = vcombine.low %v114_v6, %v118_v7  ;;  %v134_v40 = vld [vmem:[%s1750_s3 + $0xb0] sm:$0xff] }
  0x27   :  { %978 = vmatpush1.bf16.msra.mxu0 %v1172_v12  ;;  %939 = vmatpush1.bf16.msra.mxu1 %v1178_v13  ;;  %v1228_v59 = vcombine.low %v225_v56, %v229_v58  ;;  %v1229_v60 = vcombine.high %v225_v56, %v229_v58  ;;  %v233_v0 = vld [vmem:[%s1750_s3 + $0x3c8] sm:$0xff]  ;;  %v1235_v1 = vcombine.high %v232_v62, %v236_v63  ;;  %v27_v17 = vld [vmem:[%s1749_s2] sm:$0x3]  ;;  %v131_v41 = vld [vmem:[%s1750_s3 + $0x98] sm:$0xff] }
  0x28   :  { %979 = vmatprep.subr.bf16.mxu0 %v1181_v14  ;;  %940 = vmatprep.subr.bf16.mxu1 %v1187_v15  ;;  %v237_v2 = vld [vmem:[%s1750_s3 + $0x3e8] sm:$0xff]  ;;  %v1234_v5 = vcombine.low %v232_v62, %v236_v63  ;;  %v1120_v12 = vcombine.low %v115_v8, %v119_v10  ;;  %v1121_v13 = vcombine.high %v115_v8, %v119_v10  ;;  %v29_v14 = vlaneseq  ;;  %v135_v42 = vld [vmem:[%s1750_s3 + $0xb8] sm:$0xff]  ;;  %v142_v48 = vld [vmem:[%s1750_s3 + $0xf0] sm:$0xff] }
  0x29   :  { %v1236_v3 = vcombine.low %v233_v0, %v237_v2  ;;  %v1237_v4 = vcombine.high %v233_v0, %v237_v2  ;;  %v139_v49 = vld [vmem:[%s1750_s3 + $0xd8] sm:$0xff]  ;;  %v146_v55 = vld [vmem:[%s1750_s3 + $0x110] sm:$0xff] }
  0x2a   :  { %v1525_v15 = vshrl.u32 %v29_v14, 7  ;;  %v150_v56 = vld [vmem:[%s1750_s3 + $0x130] sm:$0xff]  ;;  %v151_v58 = vld [vmem:[%s1750_s3 + $0x138] sm:$0xff] }
  0x2b   :  { %980 = vmatpush1.bf16.msra.mxu0 %v1180_v20  ;;  %941 = vmatpush1.bf16.msra.mxu1 %v1186_v21  ;;  %v154_v63 = vld [vmem:[%s1750_s3 + $0x150] sm:$0xff]  ;;  %v159_v2 = vld [vmem:[%s1750_s3 + $0x178] sm:$0xff] }
  0x2c   :  { %981 = vmatprep.subr.bf16.mxu0 %v1189_v22  ;;  %942 = vmatprep.subr.bf16.mxu1 %v1195_v23  ;;  %v31_v16 = vsub.s32 0, %v1525_v15  ;;  %v35_v18 = vsub.s32 1, %v1525_v15  ;;  %v158_v0 = vld [vmem:[%s1750_s3 + $0x170] sm:$0xff]  ;;  %v167_v10 = vld [vmem:[%s1750_s3 + $0x1b8] sm:$0xff] }
  0x2d   :  { %v162_v7 = vld [vmem:[%s1750_s3 + $0x190] sm:$0xff] }
  0x2e   :  { %v32_v19 = vrot.slane %v27_v17, %v31_v16  ;;  %v36_v20 = vrot.slane %v27_v17, %v35_v18  ;;  %v166_v8 = vld [vmem:[%s1750_s3 + $0x1b0] sm:$0xff] }
  0x2f   :  { %982 = vmatpush1.bf16.msra.mxu0 %v1188_v28  ;;  %943 = vmatpush1.bf16.msra.mxu1 %v1194_v29  ;;  %v170_v17 = vld [vmem:[%s1750_s3 + $0x1d0] sm:$0xff] }
  0x30   :  { %983 = vmatprep.subr.bf16.mxu0 %v1197_v30  ;;  %944 = vmatprep.subr.bf16.mxu1 %v1203_v31  ;;  %v122_v30 = vld [vmem:[%s1750_s3 + $0x50] sm:$0xff] }
  0x31   :  { %v1126_v43 = vcombine.low %v122_v30, %v126_v32 }
  0x33   :  { %984 = vmatpush1.bf16.msra.mxu0 %v1196_v36  ;;  %945 = vmatpush1.bf16.msra.mxu1 %v1202_v37  ;;  %v130_v37 = vld [vmem:[%s1750_s3 + $0x90] sm:$0xff] }
  0x34   :  { %985 = vmatprep.subr.bf16.mxu0 %v1205_v38  ;;  %946 = vmatprep.subr.bf16.mxu1 %v1211_v39  ;;  %v1127_v38 = vcombine.high %v122_v30, %v126_v32  ;;  %v1129_v39 = vcombine.high %v123_v33, %v127_v34 }
  0x37   :  { %986 = vmatpush1.bf16.msra.mxu0 %v1204_v44  ;;  %947 = vmatpush1.bf16.msra.mxu1 %v1210_v45  ;;  %v1128_v44 = vcombine.low %v123_v33, %v127_v34  ;;  %v1135_v45 = vcombine.high %v130_v37, %v134_v40  ;;  %v186_v34 = vld [vmem:[%s1750_s3 + $0x250] sm:$0xff] }
  0x38   :  { %987 = vmatprep.subr.bf16.mxu0 %v1213_v46  ;;  %948 = vmatprep.subr.bf16.mxu1 %v1219_v47  ;;  %v1137_v46 = vcombine.high %v131_v41, %v135_v42  ;;  %v138_v47 = vld [vmem:[%s1750_s3 + $0xd0] sm:$0xff] }
  0x3b   :  { %988 = vmatpush1.bf16.msra.mxu0 %v1212_v50  ;;  %949 = vmatpush1.bf16.msra.mxu1 %v1218_v51  ;;  %v143_v50 = vld [vmem:[%s1750_s3 + $0xf8] sm:$0xff]  ;;  %v1134_v51 = vcombine.low %v130_v37, %v134_v40 }
  0x3c   :  { %989 = vmatprep.subr.bf16.mxu0 %v1221_v52  ;;  %950 = vmatprep.subr.bf16.mxu1 %v1227_v57  ;;  %v1136_v52 = vcombine.low %v131_v41, %v135_v42  ;;  %v1145_v54 = vcombine.high %v139_v49, %v143_v50  ;;  %v147_v57 = vld [vmem:[%s1750_s3 + $0x118] sm:$0xff] }
  0x3d   :  { %v1153_v62 = vcombine.high %v147_v57, %v151_v58  ;;  %v187_v37 = vld [vmem:[%s1750_s3 + $0x258] sm:$0xff] }
  0x3f   :  { %990 = vmatpush1.bf16.msra.mxu0 %v1220_v53  ;;  %951 = vmatpush1.bf16.msra.mxu1 %v1226_v61  ;;  %v1143_v53 = vcombine.high %v138_v47, %v142_v48  ;;  %v1151_v61 = vcombine.high %v146_v55, %v150_v56 }
  0x40   :  { %991 = vmatprep.subr.bf16.mxu0 %v1229_v60  ;;  %952 = vmatprep.subr.bf16.mxu1 %v1235_v1  ;;  %v1144_v60 = vcombine.low %v139_v49, %v143_v50  ;;  %v155_v1 = vld [vmem:[%s1750_s3 + $0x158] sm:$0xff] }
  0x41   :  { %v1161_v6 = vcombine.high %v155_v1, %v159_v2 }
  0x43   :  { %992 = vmatpush1.bf16.msra.mxu0 %v1228_v59  ;;  %953 = vmatpush1.bf16.msra.mxu1 %v1234_v5  ;;  %v1142_v59 = vcombine.low %v138_v47, %v142_v48  ;;  %v1159_v5 = vcombine.high %v154_v63, %v158_v0 }
  0x44   :  { %993 = vmatprep.subr.bf16.mxu0 %v1237_v4  ;;  %1004 = vmatprep.subr.bf16.mxu1 %v1119_v9  ;;  %v1152_v4 = vcombine.low %v147_v57, %v151_v58  ;;  %v163_v9 = vld [vmem:[%s1750_s3 + $0x198] sm:$0xff] }
  0x45   :  { %v1169_v14 = vcombine.high %v163_v9, %v167_v10 }
  0x47   :  { %994 = vmatpush1.bf16.msra.mxu0 %v1236_v3  ;;  %v1150_v3 = vcombine.low %v146_v55, %v150_v56 }
  0x48   :  { %1045 = vmatprep.subr.bf16.mxu0 %v1121_v13  ;;  %v1167_v13 = vcombine.high %v162_v7, %v166_v8 }
  0xdd   :  { %v97_v21 = vpop.f32.mrb[0].mxu0 }
  0xde   :  { %v98_v22 = vadd.f32 %v97_v21, %v32_v19  ;;  %v99_v23 = vpop.f32.mrb[1].mxu0  ;;  %v174_v19 = vld [vmem:[%s1750_s3 + $0x1f0] sm:$0xff]  ;;  %v175_v21 = vld [vmem:[%s1750_s3 + $0x1f8] sm:$0xff] }
  0xdf   :  { %v100_v24 = vadd.f32 %v99_v23, %v36_v20  ;;  %v101_v25 = vpop.f32.mrb[2].mxu0  ;;  %v171_v20 = vld [vmem:[%s1750_s3 + $0x1d8] sm:$0xff]  ;;  %v1168_v23 = vcombine.low %v163_v9, %v167_v10  ;;  %v1174_v30 = vcombine.low %v170_v17, %v174_v19 }
  0xe0   :  { %vm104_vm1 = vcmp.gt.f32.partialorder %v98_v22, 0.0  ;;  %v106_v26 = vmul.f32 0.01, %v98_v22  ;;  %v102_v27 = vpop.f32.mrb[3].mxu0  ;;  %v1177_v25 = vcombine.high %v171_v20, %v175_v21 }
  0xe1   :  { %vm105_vm2 = vcmp.gt.f32.partialorder %v100_v24, 0.0  ;;  %v107_v28 = vmul.f32 0.01, %v100_v24  ;;  %v182_v27 = vld [vmem:[%s1750_s3 + $0x230] sm:$0xff] }
  0xe2   :  { %v108_v29 = vsel %vm104_vm1, %v98_v22, %v106_v26  ;;  %v1166_v22 = vcombine.low %v162_v7, %v166_v8  ;;  %v178_v26 = vld [vmem:[%s1750_s3 + $0x210] sm:$0xff] }
  0xe3   :  { %v109_v31 = vsel %vm105_vm2, %v100_v24, %v107_v28  ;;  %v1548_v36 = vpack.c.bf16 %v108_v29, %v108_v29  ;;  %v1175_v24 = vcombine.high %v170_v17, %v174_v19  ;;  %v179_v28 = vld [vmem:[%s1750_s3 + $0x218] sm:$0xff]  ;;  %v1183_v32 = vcombine.high %v178_v26, %v182_v27 }
  0xe4   :  { %v111_v35 = vpack.c.bf16 %v109_v31, %v109_v31  ;;  %v183_v29 = vld [vmem:[%s1750_s3 + $0x238] sm:$0xff]  ;;  %v1176_v31 = vcombine.low %v171_v20, %v175_v21 }
  0xe5   :  { %v1185_v33 = vcombine.high %v179_v28, %v183_v29  ;;  %v1184_v40 = vcombine.low %v179_v28, %v183_v29 }
  0xe6   :  { %954 = vmatprep.mubr.bf16.mxu1 %v111_v35  ;;  %995 = vmatprep.mubr.bf16.mxu0 %v111_v35 }
  0xe7   :  { %955 = vmatmul.mubr.bf16.vlgmr.msra.gmra.mrb[0].mxu1 %v1548_v36  ;;  %996 = vmatmul.mubr.bf16.vlgmr.msra.gmra.mrb[4].mxu0 %v1548_v36 }
  0xe8   :  { %1005 = vmatpush1.bf16.msra.mxu1 %v1118_v11  ;;  %1046 = vmatpush1.bf16.msra.mxu0 %v1120_v12  ;;  %v1158_v11 = vcombine.low %v154_v63, %v158_v0  ;;  %v1160_v12 = vcombine.low %v155_v1, %v159_v2 }
  0xe9   :  { %1036 = vmatprep.mubr.bf16.mxu1 %v111_v35  ;;  %1077 = vmatprep.mubr.bf16.mxu0 %v111_v35  ;;  %v190_v35 = vld [vmem:[%s1750_s3 + $0x270] sm:$0xff] }
  0xea   :  { %1006 = vmatprep.subr.bf16.mxu1 %v1127_v38  ;;  %1047 = vmatprep.subr.bf16.mxu0 %v1129_v39  ;;  %v191_v38 = vld [vmem:[%s1750_s3 + $0x278] sm:$0xff]  ;;  %v1182_v39 = vcombine.low %v178_v26, %v182_v27  ;;  %v1191_v41 = vcombine.high %v186_v34, %v190_v35  ;;  %v1190_v47 = vcombine.low %v186_v34, %v190_v35  ;;  %v256_v34 = vsub.s32 3, %v1525_v15 }
  0xeb   :  { %v1193_v42 = vcombine.high %v187_v37, %v191_v38  ;;  %v1192_v48 = vcombine.low %v187_v37, %v191_v38 }
  0xec   :  { %1007 = vmatpush1.bf16.msra.mxu1 %v1126_v43  ;;  %1048 = vmatpush1.bf16.msra.mxu0 %v1128_v44  ;;  %v194_v43 = vld [vmem:[%s1750_s3 + $0x290] sm:$0xff] }
  0xed   :  { %1008 = vmatprep.subr.bf16.mxu1 %v1135_v45  ;;  %1049 = vmatprep.subr.bf16.mxu0 %v1137_v46  ;;  %v198_v44 = vld [vmem:[%s1750_s3 + $0x2b0] sm:$0xff]  ;;  %v195_v45 = vld [vmem:[%s1750_s3 + $0x298] sm:$0xff] }
  0xee   :  { %v199_v46 = vld [vmem:[%s1750_s3 + $0x2b8] sm:$0xff]  ;;  %v1199_v49 = vcombine.high %v194_v43, %v198_v44  ;;  %v1198_v55 = vcombine.low %v194_v43, %v198_v44 }
  0xef   :  { %v1201_v50 = vcombine.high %v195_v45, %v199_v46  ;;  %v1200_v56 = vcombine.low %v195_v45, %v199_v46 }
  0xf0   :  { %1009 = vmatpush1.bf16.msra.mxu1 %v1134_v51  ;;  %1050 = vmatpush1.bf16.msra.mxu0 %v1136_v52  ;;  %v202_v51 = vld [vmem:[%s1750_s3 + $0x2d0] sm:$0xff] }
  0xf1   :  { %1010 = vmatprep.subr.bf16.mxu1 %v1143_v53  ;;  %1051 = vmatprep.subr.bf16.mxu0 %v1145_v54  ;;  %v206_v52 = vld [vmem:[%s1750_s3 + $0x2f0] sm:$0xff]  ;;  %v203_v53 = vld [vmem:[%s1750_s3 + $0x2d8] sm:$0xff] }
  0xf2   :  { %v207_v54 = vld [vmem:[%s1750_s3 + $0x2f8] sm:$0xff]  ;;  %v1207_v57 = vcombine.high %v202_v51, %v206_v52  ;;  %v1206_v63 = vcombine.low %v202_v51, %v206_v52  ;;  %v264_v51 = vsub.s32 5, %v1525_v15  ;;  %v272_v52 = vsub.s32 7, %v1525_v15 }
  0xf3   :  { %v1209_v58 = vcombine.high %v203_v53, %v207_v54  ;;  %v1208_v0 = vcombine.low %v203_v53, %v207_v54 }
  0xf4   :  { %1011 = vmatpush1.bf16.msra.mxu1 %v1142_v59  ;;  %1052 = vmatpush1.bf16.msra.mxu0 %v1144_v60  ;;  %v210_v59 = vld [vmem:[%s1750_s3 + $0x310] sm:$0xff] }
  0xf5   :  { %1012 = vmatprep.subr.bf16.mxu1 %v1151_v61  ;;  %1053 = vmatprep.subr.bf16.mxu0 %v1153_v62  ;;  %v214_v60 = vld [vmem:[%s1750_s3 + $0x330] sm:$0xff]  ;;  %v211_v61 = vld [vmem:[%s1750_s3 + $0x318] sm:$0xff] }
  0xf6   :  { %v215_v62 = vld [vmem:[%s1750_s3 + $0x338] sm:$0xff]  ;;  %v1215_v1 = vcombine.high %v210_v59, %v214_v60  ;;  %v1214_v7 = vcombine.low %v210_v59, %v214_v60 }
  0xf7   :  { %v1217_v2 = vcombine.high %v211_v61, %v215_v62  ;;  %v1216_v8 = vcombine.low %v211_v61, %v215_v62 }
  0xf8   :  { %1013 = vmatpush1.bf16.msra.mxu1 %v1150_v3  ;;  %1054 = vmatpush1.bf16.msra.mxu0 %v1152_v4  ;;  %v218_v3 = vld [vmem:[%s1750_s3 + $0x350] sm:$0xff] }
  0xf9   :  { %1014 = vmatprep.subr.bf16.mxu1 %v1159_v5  ;;  %1055 = vmatprep.subr.bf16.mxu0 %v1161_v6  ;;  %v222_v4 = vld [vmem:[%s1750_s3 + $0x370] sm:$0xff]  ;;  %v219_v5 = vld [vmem:[%s1750_s3 + $0x358] sm:$0xff] }
  0xfa   :  { %v223_v6 = vld [vmem:[%s1750_s3 + $0x378] sm:$0xff]  ;;  %v1223_v9 = vcombine.high %v218_v3, %v222_v4  ;;  %v1222_v17 = vcombine.low %v218_v3, %v222_v4 }
  0xfb   :  { %v1225_v10 = vcombine.high %v219_v5, %v223_v6  ;;  %v1224_v19 = vcombine.low %v219_v5, %v223_v6 }
  0xfc   :  { %1015 = vmatpush1.bf16.msra.mxu1 %v1158_v11  ;;  %1056 = vmatpush1.bf16.msra.mxu0 %v1160_v12  ;;  %v226_v11 = vld [vmem:[%s1750_s3 + $0x390] sm:$0xff] }
  0xfd   :  { %1016 = vmatprep.subr.bf16.mxu1 %v1167_v13  ;;  %1057 = vmatprep.subr.bf16.mxu0 %v1169_v14  ;;  %v230_v12 = vld [vmem:[%s1750_s3 + $0x3b0] sm:$0xff]  ;;  %v227_v13 = vld [vmem:[%s1750_s3 + $0x398] sm:$0xff] }
  0xfe   :  { %v231_v14 = vld [vmem:[%s1750_s3 + $0x3b8] sm:$0xff]  ;;  %v1231_v20 = vcombine.high %v226_v11, %v230_v12  ;;  %v1230_v26 = vcombine.low %v226_v11, %v230_v12 }
  0xff   :  { %v1233_v21 = vcombine.high %v227_v13, %v231_v14  ;;  %v1232_v27 = vcombine.low %v227_v13, %v231_v14 }
 0x100   :  { %1017 = vmatpush1.bf16.msra.mxu1 %v1166_v22  ;;  %1058 = vmatpush1.bf16.msra.mxu0 %v1168_v23  ;;  %v234_v22 = vld [vmem:[%s1750_s3 + $0x3d0] sm:$0xff] }
 0x101   :  { %1018 = vmatprep.subr.bf16.mxu1 %v1175_v24  ;;  %1059 = vmatprep.subr.bf16.mxu0 %v1177_v25  ;;  %v238_v23 = vld [vmem:[%s1750_s3 + $0x3f0] sm:$0xff]  ;;  %v235_v24 = vld [vmem:[%s1750_s3 + $0x3d8] sm:$0xff] }
 0x102   :  { %v239_v25 = vld [vmem:[%s1750_s3 + $0x3f8] sm:$0xff]  ;;  %v1239_v28 = vcombine.high %v234_v22, %v238_v23 }
 0x103   :  { %v1241_v29 = vcombine.high %v235_v24, %v239_v25 }
 0x104   :  { %1019 = vmatpush1.bf16.msra.mxu1 %v1174_v30  ;;  %1060 = vmatpush1.bf16.msra.mxu0 %v1176_v31  ;;  %v1238_v30 = vcombine.low %v234_v22, %v238_v23  ;;  %v1240_v31 = vcombine.low %v235_v24, %v239_v25 }
 0x105   :  { %1020 = vmatprep.subr.bf16.mxu1 %v1183_v32  ;;  %1061 = vmatprep.subr.bf16.mxu0 %v1185_v33  ;;  %v252_v32 = vsub.s32 2, %v1525_v15  ;;  %v240_v33 = vld [vmem:[%s1751_s4] sm:$0xff]  ;;  %s1275_s4 = smov [#allocation2]  }
 0x106   :  { %v245_v35 = vrot.slane %v240_v33, %v31_v16  ;;  %v249_v38 = vrot.slane %v240_v33, %v35_v18  ;;  %v260_v16 = vsub.s32 4, %v1525_v15  ;;  %v268_v18 = vsub.s32 6, %v1525_v15  ;;  %s1101_s13 = sshll.u32 %s1275_s4, 4  ;;  %s1102_s13 = int_to_ptr.vmem [resolvable:$true] %s1101_s13 }
 0x107   :  { %v253_v37 = vrot.slane %v240_v33, %v252_v32  ;;  %s1250_s14 = scalar_lea.vmem %s1102_s13, 1024  ;;  %p1255_p1 = scmp.lt.s32.totalorder %s1102_s13, %s1102_s13 }
 0x108   :  { %1021 = vmatpush1.bf16.msra.mxu1 %v1182_v39  ;;  %1062 = vmatpush1.bf16.msra.mxu0 %v1184_v40  ;;  %v257_v39 = vrot.slane %v240_v33, %v256_v34  ;;  %v261_v53 = vrot.slane %v240_v33, %v260_v16  ;;  %v269_v54 = vrot.slane %v240_v33, %v268_v18  ;;  %p1251_p0 = scmp.ne.s32.totalorder %s1102_s13, %s1250_s14  ;;  %p1256_p2 = scmp.lt.s32.totalorder %s1250_s14, %s1250_s14 }
 0x109   :  { %1022 = vmatprep.subr.bf16.mxu1 %v1191_v41  ;;  %1063 = vmatprep.subr.bf16.mxu0 %v1193_v42 }
 0x10a   :  { %p1257_p3 = por %p1256_p2, %p1255_p1 }
 0x10c   :  { %1023 = vmatpush1.bf16.msra.mxu1 %v1190_v47  ;;  %1064 = vmatpush1.bf16.msra.mxu0 %v1192_v48  ;;  %p1258_p4 = pnand %p1257_p3, %p1251_p0 }
 0x10d   :  { %1024 = vmatprep.subr.bf16.mxu1 %v1199_v49  ;;  %1065 = vmatprep.subr.bf16.mxu0 %v1201_v50 }
 0x110   :  { %1025 = vmatpush1.bf16.msra.mxu1 %v1198_v55  ;;  %1066 = vmatpush1.bf16.msra.mxu0 %v1200_v56  ;;  %v265_v55 = vrot.slane %v240_v33, %v264_v51  ;;  %v273_v56 = vrot.slane %v240_v33, %v272_v52 }
 0x111   :  { %1026 = vmatprep.subr.bf16.mxu1 %v1207_v57  ;;  %1067 = vmatprep.subr.bf16.mxu0 %v1209_v58 }
 0x114   :  { %1027 = vmatpush1.bf16.msra.mxu1 %v1206_v63  ;;  %1068 = vmatpush1.bf16.msra.mxu0 %v1208_v0 }
 0x115   :  { %1028 = vmatprep.subr.bf16.mxu1 %v1215_v1  ;;  %1069 = vmatprep.subr.bf16.mxu0 %v1217_v2 }
 0x118   :  { %1029 = vmatpush1.bf16.msra.mxu1 %v1214_v7  ;;  %1070 = vmatpush1.bf16.msra.mxu0 %v1216_v8 }
 0x119   :  { %1030 = vmatprep.subr.bf16.mxu1 %v1223_v9  ;;  %1071 = vmatprep.subr.bf16.mxu0 %v1225_v10 }
 0x11c   :  { %1031 = vmatpush1.bf16.msra.mxu1 %v1222_v17  ;;  %1072 = vmatpush1.bf16.msra.mxu0 %v1224_v19 }
 0x11d   :  { %1032 = vmatprep.subr.bf16.mxu1 %v1231_v20  ;;  %1073 = vmatprep.subr.bf16.mxu0 %v1233_v21 }
 0x120   :  { %1033 = vmatpush1.bf16.msra.mxu1 %v1230_v26  ;;  %1074 = vmatpush1.bf16.msra.mxu0 %v1232_v27 }
 0x121   :  { %1034 = vmatprep.subr.bf16.mxu1 %v1239_v28  ;;  %1075 = vmatprep.subr.bf16.mxu0 %v1241_v29 }
 0x124   :  { %1035 = vmatpush1.bf16.msra.mxu1 %v1238_v30  ;;  %1076 = vmatpush1.bf16.msra.mxu0 %v1240_v31 }
 0x127   :  { %1037 = vmatmul.mubr.bf16.vlgmr.msra.gmra.mrb[4].mxu1 %v1548_v36  ;;  %1078 = vmatmul.mubr.bf16.vlgmr.msra.gmra.mrb[8].mxu0 %v1548_v36 }
 0x1ba   :  { %v956_v40 = vpop.f32.mrb[0].mxu1  ;;  %v997_v41 = vpop.f32.mrb[4].mxu0 }
 0x1bb   :  { %v957_v42 = vadd.f32 %v956_v40, %v245_v35  ;;  %v998_v36 = vadd.f32 %v997_v41, %v253_v37  ;;  %v958_v43 = vpop.f32.mrb[1].mxu1  ;;  %v999_v44 = vpop.f32.mrb[5].mxu0 }
 0x1bc   :  { %v959_v45 = vadd.f32 %v958_v43, %v249_v38  ;;  %v1000_v46 = vadd.f32 %v999_v44, %v257_v39  ;;  %v960_v47 = vpop.f32.mrb[2].mxu1  ;;  %v1001_v48 = vpop.f32.mrb[6].mxu0 }
 0x1bd   :  { %1086 = vst [vmem:[#allocation2] sm:$0xff] %v957_v42  ;;  %1088 = vst [vmem:[#allocation2 + $0x10] sm:$0xff] %v998_v36  ;;  %v961_v49 = vpop.f32.mrb[3].mxu1  ;;  %v1002_v50 = vpop.f32.mrb[7].mxu0 }
 0x1be   :  { %1087 = vst [vmem:[#allocation2 + $0x8] sm:$0xff] %v959_v45  ;;  %1089 = vst [vmem:[#allocation2 + $0x18] sm:$0xff] %v1000_v46 }
 0x1fa   :  { %v1038_v57 = vpop.f32.mrb[4].mxu1  ;;  %v1079_v58 = vpop.f32.mrb[8].mxu0 }
 0x1fb   :  { %v1039_v59 = vadd.f32 %v1038_v57, %v261_v53  ;;  %v1080_v60 = vadd.f32 %v1079_v58, %v269_v54  ;;  %v1040_v61 = vpop.f32.mrb[5].mxu1  ;;  %v1081_v62 = vpop.f32.mrb[9].mxu0 }
 0x1fc   :  { %v1041_v63 = vadd.f32 %v1040_v61, %v265_v55  ;;  %v1082_v0 = vadd.f32 %v1081_v62, %v273_v56  ;;  %v1042_v1 = vpop.f32.mrb[6].mxu1  ;;  %v1083_v2 = vpop.f32.mrb[10].mxu0 }
 0x1fd   :  { %1090 = vst [vmem:[#allocation2 + $0x20] sm:$0xff] %v1039_v59  ;;  %1092 = vst [vmem:[#allocation2 + $0x30] sm:$0xff] %v1080_v60  ;;  %v1043_v15 = vpop.f32.mrb[7].mxu1  ;;  %v1084_v3 = vpop.f32.mrb[11].mxu0 }
 0x1fe   :  { %1091 = vst [vmem:[#allocation2 + $0x28] sm:$0xff] %v1041_v63  ;;  %1094 = vst.msk [vmem:[#allocation2 + $0x38] sm:$0xff] %vm1093_vm3, %v1082_v0 }
 0x1ff   :  { %1261 = shalt.err (!%p1258_p4)
}
 0x200   :  { %s1262_s17 = scalar_lea.hbm %s1752_s5, 1024 }
 0x201   :  { %p1263_p5 = scmp.ne.s32.totalorder %s1752_s5, %s1262_s17  ;;  %p1266_p6 = scmp.lt.u32.totalorder %s1262_s17, %s1752_s5 }
 0x203   :  { %p1268_p7 = pnand %p1266_p6, %p1263_p5 }
 0x205   :  { %1271 = shalt.err (!%p1268_p7)
}
 0x206   :  { %1104 = dma.vmem_to_hbm [thread:$0]  %s1102_s13, 1024, %s1752_s5, [#allocation3]  }
 0x207   :  { %1272 = dma.done.wait [#allocation3], 1024  }
 0x208   :  { %1273 = vsyncadd [#allocation3], 4294966272 }
 0x209   :  { %1108 = vsyncpa [#allocation3], 1 }

</bundles_post_ra>
